<compile_context>
chip_gen: v5e
topology: v5e:2x2
jax: 0.10.0
libtpu: 0.0.40
codegen_flags: <defaults>
</compile_context>

<pallas_src>
import jax
import jax.numpy as jnp
from jax.experimental import pallas as pl
from jax.experimental.pallas import tpu as pltpu

BN_EPS = 1e-5
_LANE = 128


# --------------------------------------------------------------------------
# Tile / VMEM heuristics
# --------------------------------------------------------------------------
def _round_up(a, b):
    return (a + b - 1) // b * b


def _device_kind():
    try:
        return jax.devices()[0].device_kind.lower()
    except Exception:
        return ""


def _vmem_limit_bytes():
    cap = None
    try:
        cap = getattr(pltpu.get_tpu_info(), "vmem_capacity_bytes", None)
    except Exception:
        cap = None
    if not cap:
        cap = (64 if "v7" in _device_kind() else 128) * 1024 * 1024
    # Leave 25% headroom for compiler-internal scratch / spills.
    return int(cap) * 3 // 4


def _choose_tm(m_pad, kind):
    """Feature (output) tile width."""
    narrow_mxu = any(v in kind for v in ("v2", "v3", "v4", "v5"))
    if narrow_mxu or m_pad % 256 != 0:
        return 128                       # v5e MXU is natively 128-wide
    if "v7" in kind and m_pad == 256:
        return 128                       # keep >=2 'parallel' steps for 2 TCs
    return 256                           # v6e/v7x 256-wide MXU


def _choose_tk(n, k, tm, x_bytes, out_bytes, vmem_limit):
    """Contraction tile width (and number of K steps)."""
    def fits(tk, nk):
        x_buf = n * tk * x_bytes * (1 if nk == 1 else 2)   # resident / 2-buf
        w_buf = 2 * tk * tm * 2                            # bf16 W, 2-buf
        o_buf = 2 * n * tm * out_bytes                     # out tile, 2-buf
        acc = n * tm * 4                                    # f32 accumulator
        gb = 2 * 2 * tm * 4 * 2                             # gamma/beta tiles
        tmps = 2 * n * tm * 4                               # f32 temporaries
        return x_buf + w_buf + o_buf + acc + gb + tmps <= vmem_limit

    if k <= _LANE or fits(k, 1):
        return k, 1                      # whole-K resident (single x buffer)
    units = k // _LANE                   # k is a multiple of 128 here
    for nk in range(2, units + 1):
        if units % nk:
            continue
        tk = k // nk
        if fits(tk, nk):
            return tk, nk
    return _LANE, units                  # last resort (see N-tiling TODO)


# --------------------------------------------------------------------------
# Kernel
# --------------------------------------------------------------------------
def batch_dence_kernel(x_ref, w_ref, gb_ref, o_ref, acc_ref):
    # x_ref:   (N, TK)   f32 or bf16 activation tile
    # w_ref:   (TK, TM)  bf16 weight tile, already (K, o_dim) layout
    # gb_ref:  (2, TM)   f32 [gamma; beta] tile
    # o_ref:   (N, TM)   output tile (f32 or bf16)
    # acc_ref: (N, TM)   f32 matmul accumulator (VMEM scratch)
    ki = pl.program_id(1)

    @pl.when(ki == 0)
    def _init():
        acc_ref[...] = jnp.zeros_like(acc_ref)

    x = x_ref[...]
    if x.dtype != jnp.bfloat16:
        x = x.astype(jnp.bfloat16)       # cast in-kernel; no wrapper HBM pass
    acc_ref[...] += jnp.dot(x, w_ref[...], preferred_element_type=jnp.float32)

    @pl.when(ki == pl.num_programs(1) - 1)
    def _epilogue():
        y = acc_ref[...]                                  # (N, TM) f32
        inv_n = 1.0 / y.shape[0]
        mean = jnp.sum(y, axis=0, keepdims=True) * inv_n  # (1, TM)
        centered = y - mean
        # Two-pass (mean-subtracted) biased variance: numerically safe, and
        # `centered` is needed for the normalization anyway.
        var = jnp.sum(centered * centered, axis=0, keepdims=True) * inv_n
        inv_std = jax.lax.rsqrt(var + BN_EPS)

        scale = inv_std * gb_ref[0:1, :]                  # gamma folded
        z = centered * scale + gb_ref[1:2, :]             # + beta

        # Swish with a single EUP op: sigmoid(z) = 0.5*tanh(z/2) + 0.5
        sig = 0.5 * jnp.tanh(0.5 * z) + 0.5
        o_ref[...] = (z * sig).astype(o_ref.dtype)


# --------------------------------------------------------------------------
# Wrappers
# --------------------------------------------------------------------------
def prepare_batch_dence_params(weight, gamma, beta):
    """One-time parameter packing (hoist this out of the per-call path).

    weight: (o_dim, i_dim) in PyTorch nn.Linear layout.
    Returns (w_kn, gb, o_dim):
      w_kn: (k_pad, o_pad) bf16   — transposed so the kernel contracts RHS dim 0
      gb:   (2, o_pad)     f32    — stacked [gamma; beta], zero-padded tail
    """
    o_dim, k = weight.shape
    m_pad = _round_up(o_dim, _LANE)
    k_pad = _round_up(k, _LANE) if k > _LANE else k
    w = weight.astype(jnp.bfloat16).T                      # (k, o_dim)
    w = jnp.pad(w, ((0, k_pad - k), (0, m_pad - o_dim)))
    g = jnp.pad(gamma.astype(jnp.float32), (0, m_pad - o_dim))
    b = jnp.pad(beta.astype(jnp.float32), (0, m_pad - o_dim))
    gb = jnp.stack([g, b], axis=0)                         # (2, m_pad)
    return w, gb, o_dim


def batch_dence(x, w_kn, gb, o_dim, *, out_dtype=jnp.float32, tm=None, tk=None):
    """Fused Linear -> BatchNorm1d(train) -> Swish.

    x: (N, i_dim) f32 or bf16.  w_kn/gb from prepare_batch_dence_params().
    The Linear bias is intentionally absent: it cancels against the
    training-mode BatchNorm mean subtraction.
    """
    n, k_in = x.shape
    k_pad, m_pad = w_kn.shape
    if k_in != k_pad:                    # only when k > 128 and k % 128 != 0
        x = jnp.pad(x, ((0, 0), (0, k_pad - k_in)))

    kind = _device_kind()
    vmem_limit = _vmem_limit_bytes()
    x_bytes = jnp.dtype(x.dtype).itemsize
    out_bytes = jnp.dtype(out_dtype).itemsize

    if tm is None:
        tm = _choose_tm(m_pad, kind)
    assert m_pad % tm == 0, (m_pad, tm)
    if tk is None:
        tk, nk = _choose_tk(n, k_pad, tm, x_bytes, out_bytes, vmem_limit)
    else:
        assert k_pad % tk == 0, (k_pad, tk)
        nk = k_pad // tk

    # x is grid-invariant when K is not tiled -> single buffer (saves VMEM).
    if nk == 1:
        x_spec = pl.BlockSpec((n, tk), lambda j, ki: (0, ki),
                              pipeline_mode=pl.Buffered(1))
    else:
        x_spec = pl.BlockSpec((n, tk), lambda j, ki: (0, ki))

    out = pl.pallas_call(
        batch_dence_kernel,
        out_shape=jax.ShapeDtypeStruct((n, m_pad), out_dtype),
        grid_spec=pltpu.PrefetchScalarGridSpec(
            num_scalar_prefetch=0,
            grid=(m_pad // tm, nk),
            in_specs=[
                x_spec,                                             # x
                pl.BlockSpec((tk, tm), lambda j, ki: (ki, j)),      # W tile
                pl.BlockSpec((2, tm), lambda j, ki: (0, j)),        # gamma/beta
            ],
            out_specs=pl.BlockSpec((n, tm), lambda j, ki: (0, j)),
            scratch_shapes=[pltpu.VMEM((n, tm), jnp.float32)],      # acc
        ),
        compiler_params=pltpu.CompilerParams(
            dimension_semantics=("parallel", "arbitrary"),
            vmem_limit_bytes=vmem_limit,
        ),
    )(x, w_kn, gb)

    return out[:, :o_dim] if m_pad != o_dim else out


def batch_dence_module(x, weight, bias, gamma, beta, **kwargs):
    """Convenience wrapper matching the PyTorch module's parameters.

    `bias` is accepted for API parity with nn.Linear but is mathematically
    cancelled by the training-mode BatchNorm mean subtraction, so it is not
    fed to the kernel.  Prefer prepare_batch_dence_params() + batch_dence()
    to hoist the per-call weight cast/pad/transpose.
    """
    del bias
    w_kn, gb, o_dim = prepare_batch_dence_params(weight, gamma, beta)
    return batch_dence(x, w_kn, gb, o_dim, **kwargs)


def batch_dence_ref(x, weight, bias, gamma, beta):
    # Full-f32 reference of the PyTorch module (Linear+bias -> BN(train) -> Swish).
    y = x @ weight.T + bias
    mean = jnp.mean(y, axis=0, keepdims=True)
    var = jnp.mean((y - mean) ** 2, axis=0, keepdims=True)
    z = (y - mean) / jnp.sqrt(var + BN_EPS) * gamma + beta
    return z * jax.nn.sigmoid(z)


# --------------------------------------------------------------------------
# Self-test
# --------------------------------------------------------------------------
if __name__ == "__main__":
    root = jax.random.PRNGKey(0)

    def run_case(case_id, n, i_dim, o_dim, out_dtype, tol, tm=None, tk=None,
                 use_module_wrapper=False):
        key = jax.random.fold_in(root, case_id)
        kx, kw, kb, kg, kbt = jax.random.split(key, 5)
        x = jax.random.normal(kx, (n, i_dim), dtype=jnp.float32)
        bound = 1.0 / (i_dim ** 0.5)
        weight = jax.random.uniform(kw, (o_dim, i_dim), minval=-bound,
                                    maxval=bound, dtype=jnp.float32)
        bias = jax.random.uniform(kb, (o_dim,), minval=-bound, maxval=bound,
                                  dtype=jnp.float32)
        gamma = jax.random.uniform(kg, (o_dim,), minval=0.5, maxval=1.5,
                                   dtype=jnp.float32)
        beta = 0.1 * jax.random.normal(kbt, (o_dim,), dtype=jnp.float32)

        if use_module_wrapper:
            out = batch_dence_module(x, weight, bias, gamma, beta,
                                     out_dtype=out_dtype, tm=tm, tk=tk)
        else:
            w_kn, gb, od = prepare_batch_dence_params(weight, gamma, beta)
            out = batch_dence(x, w_kn, gb, od, out_dtype=out_dtype, tm=tm, tk=tk)
        jax.block_until_ready(out)

        ref = batch_dence_ref(x, weight, bias, gamma, beta)
        assert out.shape == ref.shape, (out.shape, ref.shape)
        assert out.dtype == out_dtype
        assert jnp.allclose(out.astype(jnp.float32), ref, atol=tol, rtol=tol), \
            f"case {case_id}: max err {jnp.max(jnp.abs(out.astype(jnp.float32) - ref))}"

    # 1) Module-sized small case: whole-K resident, single x buffer, f32 out.
    run_case(1, n=16, i_dim=32, o_dim=64, out_dtype=jnp.float32, tol=3e-2)
    # 2) K-tiled accumulation (nk=2) + multi-step feature grid + padded o tail.
    run_case(2, n=64, i_dim=256, o_dim=320, out_dtype=jnp.float32, tol=5e-2,
             tm=128, tk=128)
    # 3) bf16 output path via the module-style convenience wrapper.
    run_case(3, n=16, i_dim=32, o_dim=64, out_dtype=jnp.bfloat16, tol=1e-1,
             use_module_wrapper=True)

    print("KERNEL_OK")
</pallas_src>

<mosaic_0001>
module attributes {stable_mosaic.version = 11 : i64} {
  func.func @batch_dence_kernel(%arg0: i32, %arg1: i32, %arg2: memref<16x32xf32, #tpu.memory_space<vmem>>, %arg3: memref<32x128xbf16, #tpu.memory_space<vmem>>, %arg4: memref<2x128xf32, #tpu.memory_space<vmem>>, %arg5: memref<16x128xf32, #tpu.memory_space<vmem>>, %arg6: memref<16x128xf32, #tpu.memory_space<vmem>>) attributes {dimension_semantics = [#tpu.dimension_semantics<parallel>, #tpu.dimension_semantics<arbitrary>], iteration_bounds = array<i64: 1, 1>, scalar_prefetch = 0 : i64, scratch_operands = 1 : i64, tpu.core_type = #tpu.core_type<tc>, window_params = [{pipeline_mode = #tpu.pipeline_mode<synchronous>, transform_indices = @transform_0, window_bounds = array<i64: 16, 32>}, {transform_indices = @transform_1, window_bounds = array<i64: 32, 128>}, {transform_indices = @transform_2, window_bounds = array<i64: 2, 128>}, {transform_indices = @transform_3, window_bounds = array<i64: 16, 128>}]} {
    %c0_i32 = arith.constant 0 : i32
    %0 = arith.cmpi eq, %arg1, %c0_i32 : i32
    %1 = arith.extui %0 : i1 to i32
    %c0_i32_0 = arith.constant 0 : i32
    %2 = arith.cmpi ne, %1, %c0_i32_0 : i32
    scf.if %2 {
      %cst_10 = arith.constant 0.000000e+00 : f32
      %13 = vector.broadcast %cst_10 : f32 to vector<16x128xf32>
      %c0_11 = arith.constant 0 : index
      %c0_12 = arith.constant 0 : index
      %14 = vector.load %arg6[%c0_11, %c0_12] : memref<16x128xf32, #tpu.memory_space<vmem>>, vector<16x128xf32>
      tpu.vector_store %arg6[%c0_11, %c0_12], %13 {strides = array<i32>} : memref<16x128xf32, #tpu.memory_space<vmem>>, vector<16x128xf32>,
    } else {
    }
    %c0 = arith.constant 0 : index
    %c0_1 = arith.constant 0 : index
    %3 = vector.load %arg2[%c0, %c0_1] : memref<16x32xf32, #tpu.memory_space<vmem>>, vector<16x32xf32>
    %4 = arith.truncf %3 : vector<16x32xf32> to vector<16x32xbf16>
    %c0_2 = arith.constant 0 : index
    %c0_3 = arith.constant 0 : index
    %5 = vector.load %arg6[%c0_2, %c0_3] : memref<16x128xf32, #tpu.memory_space<vmem>>, vector<16x128xf32>
    %c0_4 = arith.constant 0 : index
    %c0_5 = arith.constant 0 : index
    %6 = vector.load %arg3[%c0_4, %c0_5] : memref<32x128xbf16, #tpu.memory_space<vmem>>, vector<32x128xbf16>
    %cst = arith.constant dense<0.000000e+00> : vector<16x128xf32>
    %7 = tpu.matmul %4, %6, %cst {dimension_numbers = #tpu.dot_dimension_numbers<[1], [0], [0], [1], [0, 0, 1, 1], [], []>} : vector<16x32xbf16>, vector<32x128xbf16>, vector<16x128xf32> -> vector<16x128xf32>
    %8 = arith.addf %5, %7 : vector<16x128xf32>
    %c0_6 = arith.constant 0 : index
    %c0_7 = arith.constant 0 : index
    %9 = vector.load %arg6[%c0_6, %c0_7] : memref<16x128xf32, #tpu.memory_space<vmem>>, vector<16x128xf32>
    tpu.vector_store %arg6[%c0_6, %c0_7], %8 {strides = array<i32>} : memref<16x128xf32, #tpu.memory_space<vmem>>, vector<16x128xf32>,
    %c0_i32_8 = arith.constant 0 : i32
    %10 = arith.cmpi eq, %arg1, %c0_i32_8 : i32
    %11 = arith.extui %10 : i1 to i32
    %c0_i32_9 = arith.constant 0 : i32
    %12 = arith.cmpi ne, %11, %c0_i32_9 : i32
    scf.if %12 {
      %c0_10 = arith.constant 0 : index
      %c0_11 = arith.constant 0 : index
      %13 = vector.load %arg6[%c0_10, %c0_11] : memref<16x128xf32, #tpu.memory_space<vmem>>, vector<16x128xf32>
      %cst_12 = arith.constant dense<0.000000e+00> : vector<128xf32>
      %14 = vector.multi_reduction <add>, %13, %cst_12 [0] : vector<16x128xf32> to vector<128xf32>
      %15 = vector.shape_cast %14 : vector<128xf32> to vector<1x128xf32>
      %cst_13 = arith.constant 6.250000e-02 : f32
      %16 = vector.broadcast %cst_13 : f32 to vector<1x128xf32>
      %17 = arith.mulf %15, %16 : vector<1x128xf32>
      %18 = vector.broadcast %17 : vector<1x128xf32> to vector<16x128xf32>
      %19 = arith.subf %13, %18 : vector<16x128xf32>
      %20 = arith.mulf %19, %19 : vector<16x128xf32>
      %cst_14 = arith.constant dense<0.000000e+00> : vector<128xf32>
      %21 = vector.multi_reduction <add>, %20, %cst_14 [0] : vector<16x128xf32> to vector<128xf32>
      %22 = vector.shape_cast %21 : vector<128xf32> to vector<1x128xf32>
      %cst_15 = arith.constant 6.250000e-02 : f32
      %23 = vector.broadcast %cst_15 : f32 to vector<1x128xf32>
      %24 = arith.mulf %22, %23 : vector<1x128xf32>
      %cst_16 = arith.constant 9.99999974E-6 : f32
      %25 = vector.broadcast %cst_16 : f32 to vector<1x128xf32>
      %26 = arith.addf %24, %25 : vector<1x128xf32>
      %27 = math.rsqrt %26 : vector<1x128xf32>
      %c0_17 = arith.constant 0 : index
      %c0_18 = arith.constant 0 : index
      %28 = vector.load %arg4[%c0_17, %c0_18] : memref<2x128xf32, #tpu.memory_space<vmem>>, vector<1x128xf32>
      %29 = arith.mulf %27, %28 : vector<1x128xf32>
      %30 = vector.broadcast %29 : vector<1x128xf32> to vector<16x128xf32>
      %31 = arith.mulf %19, %30 : vector<16x128xf32>
      %c1 = arith.constant 1 : index
      %c0_19 = arith.constant 0 : index
      %32 = vector.load %arg4[%c1, %c0_19] : memref<2x128xf32, #tpu.memory_space<vmem>>, vector<1x128xf32>
      %33 = vector.broadcast %32 : vector<1x128xf32> to vector<16x128xf32>
      %34 = arith.addf %31, %33 : vector<16x128xf32>
      %cst_20 = arith.constant 5.000000e-01 : f32
      %35 = vector.broadcast %cst_20 : f32 to vector<16x128xf32>
      %36 = arith.mulf %35, %34 : vector<16x128xf32>
      %37 = math.tanh %36 : vector<16x128xf32>
      %cst_21 = arith.constant 5.000000e-01 : f32
      %38 = vector.broadcast %cst_21 : f32 to vector<16x128xf32>
      %39 = arith.mulf %38, %37 : vector<16x128xf32>
      %cst_22 = arith.constant 5.000000e-01 : f32
      %40 = vector.broadcast %cst_22 : f32 to vector<16x128xf32>
      %41 = arith.addf %39, %40 : vector<16x128xf32>
      %42 = arith.mulf %34, %41 : vector<16x128xf32>
      %c0_23 = arith.constant 0 : index
      %c0_24 = arith.constant 0 : index
      %43 = vector.load %arg5[%c0_23, %c0_24] : memref<16x128xf32, #tpu.memory_space<vmem>>, vector<16x128xf32>
      tpu.vector_store %arg5[%c0_23, %c0_24], %42 {strides = array<i32>} : memref<16x128xf32, #tpu.memory_space<vmem>>, vector<16x128xf32>,
    } else {
    }
    return
  }
  func.func @transform_0(%arg0: i32, %arg1: i32) -> (i32, i32) {
    %c0_i32 = arith.constant 0 : i32
    %c0_i32_0 = arith.constant 0 : i32
    return %c0_i32, %arg1 : i32, i32
  }
  func.func @transform_1(%arg0: i32, %arg1: i32) -> (i32, i32) {
    %c0_i32 = arith.constant 0 : i32
    return %arg1, %arg0 : i32, i32
  }
  func.func @transform_2(%arg0: i32, %arg1: i32) -> (i32, i32) {
    %c0_i32 = arith.constant 0 : i32
    %c0_i32_0 = arith.constant 0 : i32
    return %c0_i32, %arg0 : i32, i32
  }
  func.func @transform_3(%arg0: i32, %arg1: i32) -> (i32, i32) {
    %c0_i32 = arith.constant 0 : i32
    %c0_i32_0 = arith.constant 0 : i32
    return %c0_i32, %arg0 : i32, i32
  }
}

</mosaic_0001>

<bundles_post_ra>
// kernel: tpu_custom_call.1
= control target key start
LH: loop header
LB: loop body
LE: loop exit
PB: predicated region body
PF: predicated region fallthrough
CT: control target
= control target key end

     0   :  { %8 = vsyncpa [#allocation4], 0  ;;  %s361_s0 = inlined_call_operand.hbm [shape: f32[16,32], index: 0, kind: input, shape index: {}]   ;;  %s362_s1 = inlined_call_operand.hbm [shape: bf16[32,128], index: 1, kind: input, shape index: {}]   ;;  %s363_s2 = inlined_call_operand.hbm [shape: f32[2,128], index: 2, kind: input, shape index: {}]   ;;  %s364_s3 = inlined_call_operand.hbm [shape: f32[16,128], index: 3, kind: output, shape index: {}]  }
   0x1   :  { %9 = vsyncpa [#allocation7], 0  ;;  %s28_s14 = sshll.u32 %s362_s1, 4  ;;  %s29_s14 = int_to_ptr.hbm [resolvable:$true] %s28_s14 }
   0x2   :  { %10 = vsyncpa [#allocation5], 0  ;;  %s315_s15 = smov [#allocation6]   ;;  %s15_s19 = sshll.u32 %s361_s0, 4  ;;  %s16_s19 = int_to_ptr.hbm [resolvable:$true] %s15_s19 }
   0x3   :  { %s30_s16 = sshll.u32 %s315_s15, 4  ;;  %s316_s20 = smov 64   ;;  %s31_s16 = int_to_ptr.vmem [resolvable:$true] %s30_s16 }
   0x4   :  { %s317_s21 = smov 4   ;;  %s318_s22 = smov [#allocation3]  }
   0x5   :  { %36 = dma.hbm_to_vmem [thread:$0]  %s29_s14, 256, %s31_s16, [#allocation7], %s316_s20, %s316_s20, %s317_s21  }
   0x6   :  { %s17_s23 = sshll.u32 %s318_s22, 4  ;;  %s319_s24 = smov 128   ;;  %s18_s23 = int_to_ptr.vmem [resolvable:$true] %s17_s23 }
   0x7   :  { %s320_s25 = smov 8   ;;  %s42_s27 = sshll.u32 %s363_s2, 4  ;;  %s43_s27 = int_to_ptr.hbm [resolvable:$true] %s42_s27 }
   0x8   :  { %23 = dma.hbm_to_vmem [thread:$0]  %s16_s19, 256, %s18_s23, [#allocation4], %s319_s24, %s319_s24, %s320_s25  }
   0x9   :  { %s321_s28 = smov [#allocation8]  }
   0xa   :  { %s44_s0 = sshll.u32 %s321_s28, 4  ;;  %s45_s0 = int_to_ptr.vmem [resolvable:$true] %s44_s0 }
   0xb   :  { %47 = dma.hbm_to_vmem [thread:$0]  %s43_s27, 32, %s45_s0, [#allocation7]  }
   0xc   :  { %309 = dma.done.wait [#allocation4], 256  }
   0xd   :  { %310 = vsyncadd [#allocation4], 4294967040 }
   0xe   :  { %311 = dma.done.wait [#allocation7], 288  }
   0xf   :  { %312 = vsyncadd [#allocation7], 4294967008  ;;  %v197_v0 = vld [vmem:[#allocation6 + $0x8] sm:$0xff]  ;;  %v196_v1 = vld [vmem:[#allocation6] sm:$0xff]  ;;  %vm88_vm0 = vcmask 261120   ;;  %s322_s2 = smov [#allocation9]  }
  0x10   :  { %98 = vmatpush.bf16.msra.mxu0 %v197_v0  ;;  %v67_v2 = vld [vmem:[#allocation3] sm:$0xff]  ;;  %v68_v3 = vld [vmem:[#allocation3 + $0x8] sm:$0xff]  ;;  %s171_s29 = sshll.u32 %s322_s2, 4  ;;  %s173_s5 = sshll.u32 %s364_s3, 4  ;;  %s172_s29 = int_to_ptr.vmem [resolvable:$true] %s171_s29  ;;  %s174_s5 = int_to_ptr.hbm [resolvable:$true] %s173_s5 }
  0x11   :  { %v69_v4 = vpack.c.bf16 %v68_v3, %v67_v2  ;;  %v146_v34 = vld [vmem:[#allocation8] sm:$0x1]  ;;  %v206_v38 = vld [vmem:[#allocation8 + $0x1] ss:$0 sm:$0xff] }
  0x14   :  { %99 = vmatpush.bf16.msra.mxu0 %v196_v1 }
  0x17   :  { %195 = vmatmul.msk.bf16.vlgmr.msra.gmra.mxu0 %vm88_vm0, %v69_v4 }
  0x94   :  { %v101_v5 = vpop.f32.mrf.mxu0 }
  0x9c   :  { %v103_v6 = vpop.f32.mrf.mxu0 }
  0x9d   :  { %v115_v7 = vadd.f32 %v103_v6, %v101_v5 }
  0x9f   :  { %v116_v8 = vrot.slane %v115_v7, 4 }
  0xa1   :  { %v117_v9 = vadd.f32 %v116_v8, %v115_v7 }
  0xa3   :  { %v118_v10 = vrot.slane %v117_v9, 2 }
  0xa5   :  { %v119_v11 = vadd.f32 %v118_v10, %v117_v9 }
  0xa7   :  { %v120_v12 = vrot.slane %v119_v11, 1 }
  0xa9   :  { %v121_v13 = vadd.f32 %v120_v12, %v119_v11 }
  0xab   :  { %v122_v14 = vmul.f32 0.0625, %v121_v13 }
  0xad   :  { %v123_v15 = vsub.f32 %v101_v5, %v122_v14  ;;  %v124_v16 = vsub.f32 %v103_v6, %v122_v14 }
  0xaf   :  { %v125_v17 = vmul.f32 %v123_v15, %v123_v15  ;;  %v126_v18 = vmul.f32 %v124_v16, %v124_v16 }
  0xb1   :  { %v127_v19 = vadd.f32 %v126_v18, %v125_v17 }
  0xb3   :  { %v128_v20 = vrot.slane %v127_v19, 4 }
  0xb5   :  { %v129_v21 = vadd.f32 %v128_v20, %v127_v19 }
  0xb7   :  { %v130_v22 = vrot.slane %v129_v21, 2 }
  0xb9   :  { %v131_v23 = vadd.f32 %v130_v22, %v129_v21 }
  0xbb   :  { %v132_v24 = vrot.slane %v131_v23, 1 }
  0xbd   :  { %v133_v25 = vadd.f32 %v132_v24, %v131_v23 }
  0xbf   :  { %v134_v26 = vmul.f32 0.0625, %v133_v25 }
  0xc1   :  { %v135_v27 = vadd.f32 1e-05, %v134_v26 }
  0xc3   :  { %207 = vrsqrt.f32 %v135_v27  ;;  %vm142_vm2 = vweird.f32 %v135_v27 }
  0xc9   :  { %v208_v28 = vpop.eup %207 }
  0xca   :  { %v137_v29 = vmul.f32 %v208_v28, %v135_v27  ;;  %vm143_vm1 = vweird.f32 %v208_v28 }
  0xcb   :  { %vm144_vm3 = vmor %vm142_vm2, %vm143_vm1 }
  0xcc   :  { %v138_v30 = vmul.f32 %v208_v28, %v137_v29 }
  0xce   :  { %v139_v31 = vmul.f32 0.5, %v138_v30 }
  0xd0   :  { %v140_v32 = vsub.f32 1.5, %v139_v31 }
  0xd2   :  { %v141_v33 = vmul.f32 %v208_v28, %v140_v32 }
  0xd4   :  { %v145_v35 = vsel %vm144_vm3, %v208_v28, %v141_v33 }
  0xd5   :  { %v147_v36 = vmul.f32 %v146_v34, %v145_v35 }
  0xd7   :  { %v148_v37 = vperm.slane %v147_v36, 0 }
  0xd9   :  { %v149_v39 = vmul.f32 %v148_v37, %v123_v15  ;;  %v150_v40 = vmul.f32 %v148_v37, %v124_v16 }
  0xdb   :  { %v153_v41 = vadd.f32 %v206_v38, %v149_v39  ;;  %v154_v42 = vadd.f32 %v206_v38, %v150_v40 }
  0xdd   :  { %v155_v43 = vmul.f32 0.5, %v153_v41  ;;  %v156_v44 = vmul.f32 0.5, %v154_v42 }
  0xdf   :  { %209 = vtanh.f32 %v155_v43 }
  0xe0   :  { %211 = vtanh.f32 %v156_v44 }
  0xe5   :  { %v210_v45 = vpop.eup %209 }
  0xe6   :  { %v212_v46 = vpop.eup %211  ;;  %v159_v47 = vmul.f32 0.5, %v210_v45 }
  0xe7   :  { %v160_v48 = vmul.f32 0.5, %v212_v46 }
  0xe8   :  { %v161_v49 = vadd.f32 0.5, %v159_v47 }
  0xe9   :  { %v162_v50 = vadd.f32 0.5, %v160_v48 }
  0xea   :  { %v163_v51 = vmul.f32 %v161_v49, %v153_v41 }
  0xeb   :  { %v164_v52 = vmul.f32 %v162_v50, %v154_v42 }
  0xec   :  { %165 = vst [vmem:[#allocation9] sm:$0xff] %v163_v51 }
  0xed   :  { %166 = vst [vmem:[#allocation9 + $0x8] sm:$0xff] %v164_v52 }
  0xee   :  { %179 = dma.vmem_to_hbm [thread:$0]  %s172_s29, 256, %s174_s5, [#allocation5], %s319_s24, %s319_s24, %s320_s25  }
  0xef   :  { %313 = dma.done.wait [#allocation5], 256  }
  0xf0   :  { %314 = vsyncadd [#allocation5], 4294967040 }
  0xf1   :  { %184 = vsyncpa [#allocation4], 1 }
  0xf2   :  { %185 = vsyncpa [#allocation7], 1 }
  0xf3   :  { %186 = vsyncpa [#allocation5], 1 }

</bundles_post_ra>
